<compile_context>
chip_gen: v6e
topology: v6e:2x2x1
jax: 0.10.0
libtpu: 0.0.40
codegen_flags: <defaults>
</compile_context>

<pallas_src>
import functools

import jax
import jax.numpy as jnp
from jax.experimental import pallas as pl
from jax.experimental.pallas import tpu as pltpu

_LANE = 128      # f32 lane width (last dim)
_SUBLANE = 8     # f32 sublane width (second-to-last dim)


def _round_up(x, m):
    return (x + m - 1) // m * m


def _fused_mlp_kernel(x_ref, w_ref, b_ref, o_ref, *, num_layers):
    """x_ref: (B_pad, P)  w_ref: (L, P, P) (already (in,out))  b_ref: (L, 1, P)
    o_ref: (B_pad, P).  Layer count is small & static -> unrolled Python loop;
    activations stay in registers/VMEM for the whole network."""
    act = x_ref[...]
    for l in range(num_layers):
        y = jnp.dot(act, w_ref[l], preferred_element_type=jnp.float32)
        y = y + b_ref[l]
        if l < num_layers - 1:          # ReLU on all but the output layer
            y = jnp.maximum(y, 0.0)
        act = y
    o_ref[...] = act.astype(o_ref.dtype)
    # NOTE: at realistic sizes (large batch / layer_size) replace this single
    # block with a (B//tm, P//tn, P//tk) tiled matmul per layer (f32 VMEM
    # accumulator, pl.when init/finalize, 'parallel' batch/out axes) so DMA
    # overlaps MXU compute and work can split across the 2 TCs on v7x.


def init_simplenet_params(key, input_dim, layer_size, hidden_layers, output_dim):
    """Deterministic parameter init mirroring the PyTorch module's shapes
    (PyTorch layout: w (out, in), b (out,))."""
    params = []
    dims = [(input_dim, layer_size)]
    dims += [(layer_size, layer_size)] * hidden_layers
    dims += [(layer_size, output_dim)]
    for (fin, fout) in dims:
        key, kw, kb = jax.random.split(key, 3)
        bound = 1.0 / jnp.sqrt(jnp.float32(fin))
        w = jax.random.uniform(kw, (fout, fin), jnp.float32, -bound, bound)
        b = jax.random.uniform(kb, (fout,), jnp.float32, -bound, bound)
        params.append((w, b))
    return params


def prepare_simplenet_params(params):
    """ONE-TIME prep (hoisted out of the forward path):
    transpose each w to (in, out), zero-pad every feature dim to a common
    lane-dense width P (multiple of 128), and stack layers."""
    P = _round_up(max(max(w.shape) for w, _ in params), _LANE)
    L = len(params)
    w_stack = jnp.zeros((L, P, P), jnp.float32)
    b_stack = jnp.zeros((L, 1, P), jnp.float32)
    for l, (w, b) in enumerate(params):
        fout, fin = w.shape
        w_stack = w_stack.at[l, :fin, :fout].set(w.T.astype(jnp.float32))
        b_stack = b_stack.at[l, 0, :fout].set(b.astype(jnp.float32))
    return w_stack, b_stack, P


def simplenet_forward(x, w_stack, b_stack, output_dim):
    """x: (B, input_dim) f32; w_stack: (L, P, P); b_stack: (L, 1, P)."""
    B, fin = x.shape
    L, P, _ = w_stack.shape
    B_pad = _round_up(max(B, _SUBLANE), _SUBLANE)   # keep (8,128) tiling happy
    x_pad = jnp.zeros((B_pad, P), jnp.float32).at[:B, :fin].set(x)

    kernel = functools.partial(_fused_mlp_kernel, num_layers=L)
    out_pad = pl.pallas_call(
        kernel,
        out_shape=jax.ShapeDtypeStruct((B_pad, P), jnp.float32),
        grid=(1,),
        in_specs=[
            pl.BlockSpec((B_pad, P), lambda i: (0, 0)),
            pl.BlockSpec((L, P, P), lambda i: (0, 0, 0)),
            pl.BlockSpec((L, 1, P), lambda i: (0, 0, 0)),
        ],
        out_specs=pl.BlockSpec((B_pad, P), lambda i: (0, 0)),
        compiler_params=pltpu.CompilerParams(
            dimension_semantics=("arbitrary",)),
    )(x_pad, w_stack, b_stack)

    return out_pad[:B, :output_dim]


if __name__ == "__main__":
    # Small shapes consistent with the module's forward (flat feature vectors).
    batch = 8
    input_dim = 16
    layer_size = 32
    hidden_layers = 2
    output_dim = 8

    key = jax.random.PRNGKey(0)
    key, kx = jax.random.split(key)
    x = jax.random.normal(kx, (batch, input_dim), jnp.float32)

    params = init_simplenet_params(key, input_dim, layer_size,
                                   hidden_layers, output_dim)
    # One-time transpose/pad/stack — done at init, NOT per forward.
    w_stack, b_stack, _ = prepare_simplenet_params(params)

    out = simplenet_forward(x, w_stack, b_stack, output_dim)
    out = jax.block_until_ready(out)

    # Reference check in plain JAX (same math as the PyTorch forward).
    ref = jnp.maximum(x @ params[0][0].T + params[0][1], 0.0)
    for li in range(hidden_layers):
        w, b = params[1 + li]
        ref = jnp.maximum(ref @ w.T + b, 0.0)
    ref = ref @ params[-1][0].T + params[-1][1]

    assert out.shape == (batch, output_dim)
    assert jnp.allclose(out, ref, atol=1e-5, rtol=1e-5), \
        float(jnp.max(jnp.abs(out - ref)))

    print("KERNEL_OK")
</pallas_src>

<mosaic_0001>
module attributes {stable_mosaic.version = 11 : i64} {
  func.func @_fused_mlp_kernel(%arg0: i32, %arg1: memref<8x128xf32, #tpu.memory_space<vmem>>, %arg2: memref<4x128x128xf32, #tpu.memory_space<vmem>>, %arg3: memref<4x1x128xf32, #tpu.memory_space<vmem>>, %arg4: memref<8x128xf32, #tpu.memory_space<vmem>>) attributes {dimension_semantics = [#tpu.dimension_semantics<arbitrary>], iteration_bounds = array<i64: 1>, scalar_prefetch = 0 : i64, scratch_operands = 0 : i64, tpu.core_type = #tpu.core_type<tc>, window_params = [{pipeline_mode = #tpu.pipeline_mode<synchronous>, transform_indices = @transform_0, window_bounds = array<i64: 8, 128>}, {pipeline_mode = #tpu.pipeline_mode<synchronous>, transform_indices = @transform_1, window_bounds = array<i64: 4, 128, 128>}, {pipeline_mode = #tpu.pipeline_mode<synchronous>, transform_indices = @transform_2, window_bounds = array<i64: 4, 1, 128>}, {pipeline_mode = #tpu.pipeline_mode<synchronous>, transform_indices = @transform_3, window_bounds = array<i64: 8, 128>}]} {
    %c0 = arith.constant 0 : index
    %c0_0 = arith.constant 0 : index
    %0 = vector.load %arg1[%c0, %c0_0] : memref<8x128xf32, #tpu.memory_space<vmem>>, vector<8x128xf32>
    %c0_1 = arith.constant 0 : index
    %c0_2 = arith.constant 0 : index
    %c0_3 = arith.constant 0 : index
    %1 = vector.load %arg2[%c0_1, %c0_2, %c0_3] : memref<4x128x128xf32, #tpu.memory_space<vmem>>, vector<1x128x128xf32>
    %2 = vector.shape_cast %1 : vector<1x128x128xf32> to vector<128x128xf32>
    %cst = arith.constant dense<0.000000e+00> : vector<8x128xf32>
    %3 = tpu.matmul %0, %2, %cst {dimension_numbers = #tpu.dot_dimension_numbers<[1], [0], [0], [1], [0, 0, 1, 1], [], []>} : vector<8x128xf32>, vector<128x128xf32>, vector<8x128xf32> -> vector<8x128xf32>
    %c0_4 = arith.constant 0 : index
    %c0_5 = arith.constant 0 : index
    %c0_6 = arith.constant 0 : index
    %4 = vector.load %arg3[%c0_4, %c0_5, %c0_6] : memref<4x1x128xf32, #tpu.memory_space<vmem>>, vector<1x1x128xf32>
    %5 = vector.shape_cast %4 : vector<1x1x128xf32> to vector<1x128xf32>
    %6 = vector.broadcast %5 : vector<1x128xf32> to vector<8x128xf32>
    %7 = arith.addf %3, %6 : vector<8x128xf32>
    %cst_7 = arith.constant 0.000000e+00 : f32
    %8 = vector.broadcast %cst_7 : f32 to vector<8x128xf32>
    %9 = arith.maximumf %7, %8 : vector<8x128xf32>
    %c1 = arith.constant 1 : index
    %c0_8 = arith.constant 0 : index
    %c0_9 = arith.constant 0 : index
    %10 = vector.load %arg2[%c1, %c0_8, %c0_9] : memref<4x128x128xf32, #tpu.memory_space<vmem>>, vector<1x128x128xf32>
    %11 = vector.shape_cast %10 : vector<1x128x128xf32> to vector<128x128xf32>
    %cst_10 = arith.constant dense<0.000000e+00> : vector<8x128xf32>
    %12 = tpu.matmul %9, %11, %cst_10 {dimension_numbers = #tpu.dot_dimension_numbers<[1], [0], [0], [1], [0, 0, 1, 1], [], []>} : vector<8x128xf32>, vector<128x128xf32>, vector<8x128xf32> -> vector<8x128xf32>
    %c1_11 = arith.constant 1 : index
    %c0_12 = arith.constant 0 : index
    %c0_13 = arith.constant 0 : index
    %13 = vector.load %arg3[%c1_11, %c0_12, %c0_13] : memref<4x1x128xf32, #tpu.memory_space<vmem>>, vector<1x1x128xf32>
    %14 = vector.shape_cast %13 : vector<1x1x128xf32> to vector<1x128xf32>
    %15 = vector.broadcast %14 : vector<1x128xf32> to vector<8x128xf32>
    %16 = arith.addf %12, %15 : vector<8x128xf32>
    %cst_14 = arith.constant 0.000000e+00 : f32
    %17 = vector.broadcast %cst_14 : f32 to vector<8x128xf32>
    %18 = arith.maximumf %16, %17 : vector<8x128xf32>
    %c2 = arith.constant 2 : index
    %c0_15 = arith.constant 0 : index
    %c0_16 = arith.constant 0 : index
    %19 = vector.load %arg2[%c2, %c0_15, %c0_16] : memref<4x128x128xf32, #tpu.memory_space<vmem>>, vector<1x128x128xf32>
    %20 = vector.shape_cast %19 : vector<1x128x128xf32> to vector<128x128xf32>
    %cst_17 = arith.constant dense<0.000000e+00> : vector<8x128xf32>
    %21 = tpu.matmul %18, %20, %cst_17 {dimension_numbers = #tpu.dot_dimension_numbers<[1], [0], [0], [1], [0, 0, 1, 1], [], []>} : vector<8x128xf32>, vector<128x128xf32>, vector<8x128xf32> -> vector<8x128xf32>
    %c2_18 = arith.constant 2 : index
    %c0_19 = arith.constant 0 : index
    %c0_20 = arith.constant 0 : index
    %22 = vector.load %arg3[%c2_18, %c0_19, %c0_20] : memref<4x1x128xf32, #tpu.memory_space<vmem>>, vector<1x1x128xf32>
    %23 = vector.shape_cast %22 : vector<1x1x128xf32> to vector<1x128xf32>
    %24 = vector.broadcast %23 : vector<1x128xf32> to vector<8x128xf32>
    %25 = arith.addf %21, %24 : vector<8x128xf32>
    %cst_21 = arith.constant 0.000000e+00 : f32
    %26 = vector.broadcast %cst_21 : f32 to vector<8x128xf32>
    %27 = arith.maximumf %25, %26 : vector<8x128xf32>
    %c3 = arith.constant 3 : index
    %c0_22 = arith.constant 0 : index
    %c0_23 = arith.constant 0 : index
    %28 = vector.load %arg2[%c3, %c0_22, %c0_23] : memref<4x128x128xf32, #tpu.memory_space<vmem>>, vector<1x128x128xf32>
    %29 = vector.shape_cast %28 : vector<1x128x128xf32> to vector<128x128xf32>
    %cst_24 = arith.constant dense<0.000000e+00> : vector<8x128xf32>
    %30 = tpu.matmul %27, %29, %cst_24 {dimension_numbers = #tpu.dot_dimension_numbers<[1], [0], [0], [1], [0, 0, 1, 1], [], []>} : vector<8x128xf32>, vector<128x128xf32>, vector<8x128xf32> -> vector<8x128xf32>
    %c3_25 = arith.constant 3 : index
    %c0_26 = arith.constant 0 : index
    %c0_27 = arith.constant 0 : index
    %31 = vector.load %arg3[%c3_25, %c0_26, %c0_27] : memref<4x1x128xf32, #tpu.memory_space<vmem>>, vector<1x1x128xf32>
    %32 = vector.shape_cast %31 : vector<1x1x128xf32> to vector<1x128xf32>
    %33 = vector.broadcast %32 : vector<1x128xf32> to vector<8x128xf32>
    %34 = arith.addf %30, %33 : vector<8x128xf32>
    %c0_28 = arith.constant 0 : index
    %c0_29 = arith.constant 0 : index
    %35 = vector.load %arg4[%c0_28, %c0_29] : memref<8x128xf32, #tpu.memory_space<vmem>>, vector<8x128xf32>
    tpu.vector_store %arg4[%c0_28, %c0_29], %34 {strides = array<i32>} : memref<8x128xf32, #tpu.memory_space<vmem>>, vector<8x128xf32>,
    return
  }
  func.func @transform_0(%arg0: i32) -> (i32, i32) {
    %c0_i32 = arith.constant 0 : i32
    %c0_i32_0 = arith.constant 0 : i32
    %c0_i32_1 = arith.constant 0 : i32
    return %c0_i32, %c0_i32_0 : i32, i32
  }
  func.func @transform_1(%arg0: i32) -> (i32, i32, i32) {
    %c0_i32 = arith.constant 0 : i32
    %c0_i32_0 = arith.constant 0 : i32
    %c0_i32_1 = arith.constant 0 : i32
    %c0_i32_2 = arith.constant 0 : i32
    return %c0_i32, %c0_i32_0, %c0_i32_1 : i32, i32, i32
  }
  func.func @transform_2(%arg0: i32) -> (i32, i32, i32) {
    %c0_i32 = arith.constant 0 : i32
    %c0_i32_0 = arith.constant 0 : i32
    %c0_i32_1 = arith.constant 0 : i32
    %c0_i32_2 = arith.constant 0 : i32
    return %c0_i32, %c0_i32_0, %c0_i32_1 : i32, i32, i32
  }
  func.func @transform_3(%arg0: i32) -> (i32, i32) {
    %c0_i32 = arith.constant 0 : i32
    %c0_i32_0 = arith.constant 0 : i32
    %c0_i32_1 = arith.constant 0 : i32
    return %c0_i32, %c0_i32_0 : i32, i32
  }
}

</mosaic_0001>

<bundles_post_ra>
// kernel: tpu_custom_call.1
= control target key start
LH: loop header
LB: loop body
LE: loop exit
PB: predicated region body
PF: predicated region fallthrough
CT: control target
= control target key end

     0   :  { %8 = vsyncpa [#allocation3], 0  ;;  %s875_s0 = inlined_call_operand.hbm [shape: f32[8,128], index: 0, kind: input, shape index: {}]   ;;  %s876_s1 = inlined_call_operand.hbm [shape: f32[4,128,128], index: 1, kind: input, shape index: {}]   ;;  %s877_s2 = inlined_call_operand.hbm [shape: f32[4,1,128], index: 2, kind: input, shape index: {}]   ;;  %s878_s3 = inlined_call_operand.hbm [shape: f32[8,128], index: 3, kind: output, shape index: {}]  }
   0x1   :  { %9 = vsyncpa [#allocation6], 0 }
   0x2   :  { %10 = vsyncpa [#allocation4], 0  ;;  %s761_s12 = smov [#allocation5]  }
   0x3   :  { %s26_s13 = sshll.u32 %s761_s12, 4  ;;  %s27_s13 = int_to_ptr.vmem [resolvable:$true] %s26_s13 }
   0x4   :  { %s683_s14 = scalar_lea.vmem %s27_s13, 8192  ;;  %p688_p1 = scmp.lt.s32.totalorder %s27_s13, %s27_s13 }
   0x5   :  { %p684_p0 = scmp.ne.s32.totalorder %s27_s13, %s683_s14  ;;  %p689_p2 = scmp.lt.s32.totalorder %s683_s14, %s683_s14 }
   0x7   :  { %p690_p3 = por %p689_p2, %p688_p1 }
   0x9   :  { %p691_p4 = pnand %p690_p3, %p684_p0 }
   0xb   :  { %694 = shalt.err (!%p691_p4)
}
   0xc   :  { %s762_s15 = smov 128   ;;  %s763_s16 = smov 8  }
   0xd   :  { %32 = dma.hbm_to_vmem [thread:$0]  %s876_s1, 8192, %s27_s13, [#allocation6], %s762_s15, %s762_s15, %s763_s16  }
   0xe   :  { %s764_s19 = smov [#allocation2]   ;;  %s765_s21 = smov [#allocation7]  }
   0xf   :  { %s17_s20 = sshll.u32 %s764_s19, 4  ;;  %s38_s22 = sshll.u32 %s765_s21, 4  ;;  %s18_s20 = int_to_ptr.vmem [resolvable:$true] %s17_s20  ;;  %s39_s22 = int_to_ptr.vmem [resolvable:$true] %s38_s22 }
  0x10   :  { %s703_s23 = scalar_lea.vmem %s18_s20, 128  ;;  %p708_p6 = scmp.lt.s32.totalorder %s18_s20, %s18_s20 }
  0x11   :  { %p704_p5 = scmp.ne.s32.totalorder %s18_s20, %s703_s23  ;;  %p709_p7 = scmp.lt.s32.totalorder %s703_s23, %s703_s23 }
  0x13   :  { %p710_p8 = por %p709_p7, %p708_p6 }
  0x15   :  { %p711_p9 = pnand %p710_p8, %p704_p5 }
  0x17   :  { %714 = shalt.err (!%p711_p9)
}
  0x18   :  { %20 = dma.hbm_to_vmem [thread:$0]  %s875_s0, 128, %s18_s20, [#allocation3]  }
  0x19   :  { %s723_s26 = scalar_lea.vmem %s39_s22, 64  ;;  %p728_p11 = scmp.lt.s32.totalorder %s39_s22, %s39_s22 }
  0x1a   :  { %p724_p10 = scmp.ne.s32.totalorder %s39_s22, %s723_s26  ;;  %p729_p12 = scmp.lt.s32.totalorder %s723_s26, %s723_s26 }
  0x1c   :  { %p730_p13 = por %p729_p12, %p728_p11 }
  0x1e   :  { %p731_p0 = pnand %p730_p13, %p724_p10 }
  0x20   :  { %734 = shalt.err (!%p731_p0)
}
  0x21   :  { %s766_s1 = smov 16   ;;  %s767_s27 = smov 1  }
  0x22   :  { %44 = dma.hbm_to_vmem [thread:$0]  %s877_s2, 64, %s39_s22, [#allocation6], %s766_s1, %s766_s1, %s767_s27  }
  0x23   :  { %755 = dma.done.wait [#allocation3], 128  }
  0x24   :  { %756 = vsyncadd [#allocation3], 4294967168 }
  0x25   :  { %757 = dma.done.wait [#allocation6], 8256  }
  0x26   :  { %758 = vsyncadd [#allocation6], 4294959040  ;;  %v768_v0 = vmov 0.0   ;;  %vm769_vm0 = vmmov 0   ;;  %v70_v1 = vld [vmem:[#allocation5 + $0x78] sm:$0xff]  ;;  %v69_v2 = vld [vmem:[#allocation5 + $0x70] sm:$0xff] }
  0x27   :  { %525 = vmatprep.subr.mxu0 %v768_v0  ;;  %557 = vmatprep.mubr.msk.f32.mxu0 %vm769_vm0, %v768_v0  ;;  %v68_v3 = vld [vmem:[#allocation5 + $0x68] sm:$0xff]  ;;  %v67_v4 = vld [vmem:[#allocation5 + $0x60] sm:$0xff]  ;;  %v165_v5 = vld [vmem:[#allocation5 + $0xf8] sm:$0xff]  ;;  %s770_s0 = smov [#allocation8]  }
  0x28   :  { %560 = vmatprep.subr.mxu1 %v768_v0  ;;  %592 = vmatprep.mubr.msk.f32.mxu1 %vm769_vm0, %v768_v0  ;;  %v66_v6 = vld [vmem:[#allocation5 + $0x58] sm:$0xff]  ;;  %v164_v7 = vld [vmem:[#allocation5 + $0xf0] sm:$0xff]  ;;  %v163_v8 = vld [vmem:[#allocation5 + $0xe8] sm:$0xff]  ;;  %s443_s2 = sshll.u32 %s770_s0, 4  ;;  %s444_s2 = int_to_ptr.vmem [resolvable:$true] %s443_s2 }
  0x29   :  { %526 = vmatpush3.msra.mxu0 %v70_v1  ;;  %561 = vmatpush3.msra.mxu1 %v165_v5  ;;  %v65_v9 = vld [vmem:[#allocation5 + $0x50] sm:$0xff]  ;;  %v162_v10 = vld [vmem:[#allocation5 + $0xe0] sm:$0xff]  ;;  %v64_v11 = vld [vmem:[#allocation5 + $0x48] sm:$0xff]  ;;  %s735_s30 = scalar_lea.vmem %s444_s2, 128  ;;  %p740_p2 = scmp.lt.s32.totalorder %s444_s2, %s444_s2 }
  0x2a   :  { %527 = vmatprep.subr.mxu0 %v768_v0  ;;  %562 = vmatprep.subr.mxu1 %v768_v0  ;;  %v161_v12 = vld [vmem:[#allocation5 + $0xd8] sm:$0xff]  ;;  %v63_v13 = vld [vmem:[#allocation5 + $0x40] sm:$0xff]  ;;  %v160_v14 = vld [vmem:[#allocation5 + $0xd0] sm:$0xff]  ;;  %p736_p1 = scmp.ne.s32.totalorder %s444_s2, %s735_s30  ;;  %p741_p3 = scmp.lt.s32.totalorder %s735_s30, %s735_s30 }
  0x2b   :  { %528 = vmatpush3.msra.mxu0 %v69_v2  ;;  %563 = vmatpush3.msra.mxu1 %v164_v7  ;;  %v62_v15 = vld [vmem:[#allocation5 + $0x38] sm:$0xff]  ;;  %v159_v16 = vld [vmem:[#allocation5 + $0xc8] sm:$0xff]  ;;  %v61_v17 = vld [vmem:[#allocation5 + $0x30] sm:$0xff] }
  0x2c   :  { %529 = vmatprep.subr.mxu0 %v768_v0  ;;  %564 = vmatprep.subr.mxu1 %v768_v0  ;;  %v158_v18 = vld [vmem:[#allocation5 + $0xc0] sm:$0xff]  ;;  %v60_v19 = vld [vmem:[#allocation5 + $0x28] sm:$0xff]  ;;  %v157_v20 = vld [vmem:[#allocation5 + $0xb8] sm:$0xff]  ;;  %p742_p4 = por %p741_p3, %p740_p2 }
  0x2d   :  { %530 = vmatpush3.msra.mxu0 %v68_v3  ;;  %565 = vmatpush3.msra.mxu1 %v163_v8  ;;  %v59_v21 = vld [vmem:[#allocation5 + $0x20] sm:$0xff]  ;;  %v156_v22 = vld [vmem:[#allocation5 + $0xb0] sm:$0xff]  ;;  %v58_v23 = vld [vmem:[#allocation5 + $0x18] sm:$0xff] }
  0x2e   :  { %531 = vmatprep.subr.mxu0 %v768_v0  ;;  %566 = vmatprep.subr.mxu1 %v768_v0  ;;  %v155_v24 = vld [vmem:[#allocation5 + $0xa8] sm:$0xff]  ;;  %v57_v25 = vld [vmem:[#allocation5 + $0x10] sm:$0xff]  ;;  %v154_v26 = vld [vmem:[#allocation5 + $0xa0] sm:$0xff]  ;;  %p743_p5 = pnand %p742_p4, %p736_p1 }
  0x2f   :  { %532 = vmatpush3.msra.mxu0 %v67_v4  ;;  %567 = vmatpush3.msra.mxu1 %v162_v10  ;;  %v56_v27 = vld [vmem:[#allocation5 + $0x8] sm:$0xff]  ;;  %v153_v28 = vld [vmem:[#allocation5 + $0x98] sm:$0xff]  ;;  %v55_v29 = vld [vmem:[#allocation5] sm:$0xff] }
  0x30   :  { %533 = vmatprep.subr.mxu0 %v768_v0  ;;  %568 = vmatprep.subr.mxu1 %v768_v0  ;;  %v54_v30 = vld [vmem:[#allocation2] sm:$0xff]  ;;  %v152_v31 = vld [vmem:[#allocation5 + $0x90] sm:$0xff]  ;;  %v151_v32 = vld [vmem:[#allocation5 + $0x88] sm:$0xff] }
  0x31   :  { %534 = vmatpush3.msra.mxu0 %v66_v6  ;;  %569 = vmatpush3.msra.mxu1 %v161_v12  ;;  %v150_v33 = vld [vmem:[#allocation5 + $0x80] sm:$0xff]  ;;  %v261_v34 = vld [vmem:[#allocation5 + $0x178] sm:$0xff]  ;;  %v260_v35 = vld [vmem:[#allocation5 + $0x170] sm:$0xff] }
  0x32   :  { %535 = vmatprep.subr.mxu0 %v768_v0  ;;  %570 = vmatprep.subr.mxu1 %v768_v0  ;;  %v259_v36 = vld [vmem:[#allocation5 + $0x168] sm:$0xff]  ;;  %v258_v37 = vld [vmem:[#allocation5 + $0x160] sm:$0xff]  ;;  %v257_v38 = vld [vmem:[#allocation5 + $0x158] sm:$0xff] }
  0x33   :  { %536 = vmatpush3.msra.mxu0 %v65_v9  ;;  %571 = vmatpush3.msra.mxu1 %v160_v14  ;;  %v256_v39 = vld [vmem:[#allocation5 + $0x150] sm:$0xff]  ;;  %v255_v40 = vld [vmem:[#allocation5 + $0x148] sm:$0xff]  ;;  %v254_v41 = vld [vmem:[#allocation5 + $0x140] sm:$0xff] }
  0x34   :  { %537 = vmatprep.subr.mxu0 %v768_v0  ;;  %572 = vmatprep.subr.mxu1 %v768_v0  ;;  %v253_v42 = vld [vmem:[#allocation5 + $0x138] sm:$0xff]  ;;  %v252_v43 = vld [vmem:[#allocation5 + $0x130] sm:$0xff]  ;;  %v251_v44 = vld [vmem:[#allocation5 + $0x128] sm:$0xff] }
  0x35   :  { %538 = vmatpush3.msra.mxu0 %v64_v11  ;;  %573 = vmatpush3.msra.mxu1 %v159_v16  ;;  %v250_v45 = vld [vmem:[#allocation5 + $0x120] sm:$0xff]  ;;  %v249_v46 = vld [vmem:[#allocation5 + $0x118] sm:$0xff]  ;;  %v248_v52 = vld [vmem:[#allocation5 + $0x110] sm:$0xff] }
  0x36   :  { %539 = vmatprep.subr.mxu0 %v768_v0  ;;  %574 = vmatprep.subr.mxu1 %v768_v0  ;;  %v453_v47 = vld [vmem:[#allocation7] ss:$0 sm:$0xff]  ;;  %v247_v53 = vld [vmem:[#allocation5 + $0x108] sm:$0xff]  ;;  %v357_v55 = vld [vmem:[#allocation5 + $0x1f8] sm:$0xff] }
  0x37   :  { %540 = vmatpush3.msra.mxu0 %v63_v13  ;;  %575 = vmatpush3.msra.mxu1 %v158_v18  ;;  %v246_v54 = vld [vmem:[#allocation5 + $0x100] sm:$0xff]  ;;  %v356_v56 = vld [vmem:[#allocation5 + $0x1f0] sm:$0xff]  ;;  %v355_v57 = vld [vmem:[#allocation5 + $0x1e8] sm:$0xff] }
  0x38   :  { %541 = vmatprep.subr.mxu0 %v768_v0  ;;  %576 = vmatprep.subr.mxu1 %v768_v0  ;;  %v354_v58 = vld [vmem:[#allocation5 + $0x1e0] sm:$0xff]  ;;  %v353_v59 = vld [vmem:[#allocation5 + $0x1d8] sm:$0xff]  ;;  %v352_v60 = vld [vmem:[#allocation5 + $0x1d0] sm:$0xff] }
  0x39   :  { %542 = vmatpush3.msra.mxu0 %v62_v15  ;;  %577 = vmatpush3.msra.mxu1 %v157_v20  ;;  %v351_v61 = vld [vmem:[#allocation5 + $0x1c8] sm:$0xff]  ;;  %v350_v62 = vld [vmem:[#allocation5 + $0x1c0] sm:$0xff]  ;;  %v349_v63 = vld [vmem:[#allocation5 + $0x1b8] sm:$0xff] }
  0x3a   :  { %543 = vmatprep.subr.mxu0 %v768_v0  ;;  %578 = vmatprep.subr.mxu1 %v768_v0  ;;  %v348_v1 = vld [vmem:[#allocation5 + $0x1b0] sm:$0xff]  ;;  %v347_v2 = vld [vmem:[#allocation5 + $0x1a8] sm:$0xff]  ;;  %v346_v3 = vld [vmem:[#allocation5 + $0x1a0] sm:$0xff] }
  0x3b   :  { %544 = vmatpush3.msra.mxu0 %v61_v17  ;;  %579 = vmatpush3.msra.mxu1 %v156_v22  ;;  %v345_v4 = vld [vmem:[#allocation5 + $0x198] sm:$0xff]  ;;  %v454_v5 = vld [vmem:[#allocation7 + $0x1] ss:$0 sm:$0xff]  ;;  %v344_v10 = vld [vmem:[#allocation5 + $0x190] sm:$0xff] }
  0x3c   :  { %545 = vmatprep.subr.mxu0 %v768_v0  ;;  %580 = vmatprep.subr.mxu1 %v768_v0  ;;  %v343_v11 = vld [vmem:[#allocation5 + $0x188] sm:$0xff]  ;;  %v342_v12 = vld [vmem:[#allocation5 + $0x180] sm:$0xff] }
  0x3d   :  { %546 = vmatpush3.msra.mxu0 %v60_v19  ;;  %581 = vmatpush3.msra.mxu1 %v155_v24  ;;  %v455_v13 = vld [vmem:[#allocation7 + $0x2] ss:$0 sm:$0xff]  ;;  %v456_v18 = vld [vmem:[#allocation7 + $0x3] ss:$0 sm:$0xff] }
  0x3e   :  { %547 = vmatprep.subr.mxu0 %v768_v0  ;;  %582 = vmatprep.subr.mxu1 %v768_v0 }
  0x3f   :  { %548 = vmatpush3.msra.mxu0 %v59_v21  ;;  %583 = vmatpush3.msra.mxu1 %v154_v26 }
  0x40   :  { %549 = vmatprep.subr.mxu0 %v768_v0  ;;  %584 = vmatprep.subr.mxu1 %v768_v0 }
  0x41   :  { %550 = vmatpush3.msra.mxu0 %v58_v23  ;;  %585 = vmatpush3.msra.mxu1 %v153_v28 }
  0x42   :  { %551 = vmatprep.subr.mxu0 %v768_v0  ;;  %586 = vmatprep.subr.mxu1 %v768_v0 }
  0x43   :  { %552 = vmatpush3.msra.mxu0 %v57_v25  ;;  %587 = vmatpush3.msra.mxu1 %v152_v31 }
  0x44   :  { %553 = vmatprep.subr.mxu0 %v768_v0  ;;  %588 = vmatprep.subr.mxu1 %v768_v0 }
  0x45   :  { %554 = vmatpush3.msra.mxu0 %v56_v27  ;;  %589 = vmatpush3.msra.mxu1 %v151_v32 }
  0x46   :  { %555 = vmatprep.subr.mxu0 %v768_v0  ;;  %590 = vmatprep.subr.mxu1 %v768_v0 }
  0x47   :  { %556 = vmatpush3.msra.mxu0 %v55_v29  ;;  %591 = vmatpush3.msra.mxu1 %v150_v33 }
  0x48   :  { %558 = vmatmul.mubr.f32.vlgmr.msra.gmra.mxu0 %v54_v30  ;;  %595 = vmatprep.subr.mxu0 %v768_v0 }
  0x49   :  { %627 = vmatprep.mubr.msk.f32.mxu0 %vm769_vm0, %v768_v0  ;;  %630 = vmatprep.subr.mxu1 %v768_v0 }
  0x4a   :  { %596 = vmatpush3.msra.mxu0 %v261_v34 }
  0x4b   :  { %597 = vmatprep.subr.mxu0 %v768_v0 }
  0x4c   :  { %598 = vmatpush3.msra.mxu0 %v260_v35 }
  0x4d   :  { %599 = vmatprep.subr.mxu0 %v768_v0 }
  0x4e   :  { %600 = vmatpush3.msra.mxu0 %v259_v36 }
  0x4f   :  { %601 = vmatprep.subr.mxu0 %v768_v0 }
  0x50   :  { %602 = vmatpush3.msra.mxu0 %v258_v37 }
  0x51   :  { %603 = vmatprep.subr.mxu0 %v768_v0 }
  0x52   :  { %604 = vmatpush3.msra.mxu0 %v257_v38 }
  0x53   :  { %605 = vmatprep.subr.mxu0 %v768_v0 }
  0x54   :  { %606 = vmatpush3.msra.mxu0 %v256_v39 }
  0x55   :  { %607 = vmatprep.subr.mxu0 %v768_v0 }
  0x56   :  { %608 = vmatpush3.msra.mxu0 %v255_v40 }
  0x57   :  { %609 = vmatprep.subr.mxu0 %v768_v0 }
  0x58   :  { %610 = vmatpush3.msra.mxu0 %v254_v41 }
  0x59   :  { %611 = vmatprep.subr.mxu0 %v768_v0 }
  0x5a   :  { %612 = vmatpush3.msra.mxu0 %v253_v42 }
  0x5b   :  { %613 = vmatprep.subr.mxu0 %v768_v0 }
  0x5c   :  { %614 = vmatpush3.msra.mxu0 %v252_v43 }
  0x5d   :  { %615 = vmatprep.subr.mxu0 %v768_v0 }
  0x5e   :  { %616 = vmatpush3.msra.mxu0 %v251_v44 }
  0x5f   :  { %617 = vmatprep.subr.mxu0 %v768_v0 }
  0x60   :  { %618 = vmatpush3.msra.mxu0 %v250_v45 }
  0x61   :  { %619 = vmatprep.subr.mxu0 %v768_v0 }
  0x62   :  { %620 = vmatpush3.msra.mxu0 %v249_v46 }
  0x63   :  { %621 = vmatprep.subr.mxu0 %v768_v0 }
  0x64   :  { %622 = vmatpush3.msra.mxu0 %v248_v52 }
  0x65   :  { %623 = vmatprep.subr.mxu0 %v768_v0 }
  0x66   :  { %624 = vmatpush3.msra.mxu0 %v247_v53 }
  0x67   :  { %625 = vmatprep.subr.mxu0 %v768_v0 }
  0x68   :  { %626 = vmatpush3.msra.mxu0 %v246_v54 }
 0x108   :  { %v144_v48 = vpop.f32.mrf.mxu0 }
 0x109   :  { %v145_v49 = vadd.f32 %v453_v47, %v144_v48 }
 0x10a   :  { %v559_v50 = vpop.f32.mrf.mxu0 }
 0x10b   :  { %v148_v51 = vmax.f32 %v145_v49, 0.0 }
 0x10d   :  { %593 = vmatmul.mubr.f32.vlgmr.msra.gmra.mxu1 %v148_v51 }
 0x10e   :  { %662 = vmatprep.mubr.msk.f32.mxu1 %vm769_vm0, %v768_v0  ;;  %631 = vmatpush3.msra.mxu1 %v357_v55 }
 0x10f   :  { %632 = vmatprep.subr.mxu1 %v768_v0 }
 0x110   :  { %633 = vmatpush3.msra.mxu1 %v356_v56 }
 0x111   :  { %634 = vmatprep.subr.mxu1 %v768_v0 }
 0x112   :  { %635 = vmatpush3.msra.mxu1 %v355_v57 }
 0x113   :  { %636 = vmatprep.subr.mxu1 %v768_v0 }
 0x114   :  { %637 = vmatpush3.msra.mxu1 %v354_v58 }
 0x115   :  { %638 = vmatprep.subr.mxu1 %v768_v0 }
 0x116   :  { %639 = vmatpush3.msra.mxu1 %v353_v59 }
 0x117   :  { %640 = vmatprep.subr.mxu1 %v768_v0 }
 0x118   :  { %641 = vmatpush3.msra.mxu1 %v352_v60 }
 0x119   :  { %642 = vmatprep.subr.mxu1 %v768_v0 }
 0x11a   :  { %643 = vmatpush3.msra.mxu1 %v351_v61 }
 0x11b   :  { %644 = vmatprep.subr.mxu1 %v768_v0 }
 0x11c   :  { %645 = vmatpush3.msra.mxu1 %v350_v62 }
 0x11d   :  { %646 = vmatprep.subr.mxu1 %v768_v0 }
 0x11e   :  { %647 = vmatpush3.msra.mxu1 %v349_v63 }
 0x11f   :  { %648 = vmatprep.subr.mxu1 %v768_v0 }
 0x120   :  { %649 = vmatpush3.msra.mxu1 %v348_v1 }
 0x121   :  { %650 = vmatprep.subr.mxu1 %v768_v0 }
 0x122   :  { %651 = vmatpush3.msra.mxu1 %v347_v2 }
 0x123   :  { %652 = vmatprep.subr.mxu1 %v768_v0 }
 0x124   :  { %653 = vmatpush3.msra.mxu1 %v346_v3 }
 0x125   :  { %654 = vmatprep.subr.mxu1 %v768_v0 }
 0x126   :  { %655 = vmatpush3.msra.mxu1 %v345_v4 }
 0x127   :  { %656 = vmatprep.subr.mxu1 %v768_v0 }
 0x128   :  { %657 = vmatpush3.msra.mxu1 %v344_v10 }
 0x129   :  { %658 = vmatprep.subr.mxu1 %v768_v0 }
 0x12a   :  { %659 = vmatpush3.msra.mxu1 %v343_v11 }
 0x12b   :  { %660 = vmatprep.subr.mxu1 %v768_v0 }
 0x12c   :  { %661 = vmatpush3.msra.mxu1 %v342_v12 }
 0x1cd   :  { %v240_v6 = vpop.f32.mrf.mxu1 }
 0x1ce   :  { %v241_v7 = vadd.f32 %v454_v5, %v240_v6 }
 0x1cf   :  { %v594_v8 = vpop.f32.mrf.mxu1 }
 0x1d0   :  { %v244_v9 = vmax.f32 %v241_v7, 0.0 }
 0x1d2   :  { %628 = vmatmul.mubr.f32.vlgmr.msra.gmra.mxu0 %v244_v9 }
 0x292   :  { %v336_v14 = vpop.f32.mrf.mxu0 }
 0x293   :  { %v337_v15 = vadd.f32 %v455_v13, %v336_v14 }
 0x294   :  { %v629_v16 = vpop.f32.mrf.mxu0 }
 0x295   :  { %v340_v17 = vmax.f32 %v337_v15, 0.0 }
 0x297   :  { %663 = vmatmul.mubr.f32.vlgmr.msra.gmra.mxu1 %v340_v17 }
 0x357   :  { %v432_v19 = vpop.f32.mrf.mxu1 }
 0x358   :  { %v433_v20 = vadd.f32 %v456_v18, %v432_v19 }
 0x359   :  { %v664_v21 = vpop.f32.mrf.mxu1 }
 0x35a   :  { %436 = vst [vmem:[#allocation8] sm:$0xff] %v433_v20 }
 0x35b   :  { %746 = shalt.err (!%p743_p5)
}
 0x35c   :  { %446 = dma.vmem_to_hbm [thread:$0]  %s444_s2, 128, %s878_s3, [#allocation4]  }
 0x35d   :  { %759 = dma.done.wait [#allocation4], 128  }
 0x35e   :  { %760 = vsyncadd [#allocation4], 4294967168 }
 0x35f   :  { %450 = vsyncpa [#allocation3], 1 }
 0x360   :  { %451 = vsyncpa [#allocation6], 1 }
 0x361   :  { %452 = vsyncpa [#allocation4], 1 }

</bundles_post_ra>
